<compile_context>
chip_gen: v5e
topology: v5e:2x2
jax: 0.10.0
libtpu: 0.0.40
codegen_flags: <defaults>
</compile_context>

<pallas_src>
import jax
import jax.numpy as jnp
from jax import lax
from jax.experimental import pallas as pl
from jax.experimental.pallas import tpu as pltpu


# ------------------------------ kernel ---------------------------------------
def _make_ffn_kernel(tn, c, m, d_out, residual, compute_dtype):
    f32 = jnp.float32

    def kernel(xs_ref, xv_ref,
               ln_sg_ref, ln_sb_ref, ln_vg_ref,
               w1sa_ref, b1sa_ref, w1sb_ref, b1sb_ref, w1v_ref,
               w2s_ref, b2s_ref, w2v_ref,
               ys_ref, yv_ref):
        xs = xs_ref[...]                                   # [TN, C]    f32
        xv = xv_ref[...]                                   # [3, TN, C] f32

        # --- EquivariantLayerNorm (f32 elementwise) -------------------------
        mu = jnp.mean(xs, axis=-1, keepdims=True)
        var = jnp.mean((xs - mu) ** 2, axis=-1, keepdims=True)
        hs = (xs - mu) * lax.rsqrt(var + 1e-5) * ln_sg_ref[...] + ln_sb_ref[...]

        n2 = jnp.sum(xv * xv, axis=0)                      # [TN, C]
        inv = lax.rsqrt(jnp.mean(n2, axis=-1, keepdims=True) + 1e-5)
        hv = xv * inv[None] * ln_vg_ref[...][None]         # [3, TN, C]
        hv_flat = hv.reshape(3 * tn, c)                    # fold xyz into the M dim

        hs_m = hs.astype(compute_dtype)
        hv_m = hv_flat.astype(compute_dtype)

        # --- ff1: split weights (no lane-axis concat/slice) -----------------
        s1 = jnp.dot(hs_m, w1sa_ref[...],
                     preferred_element_type=f32) + b1sa_ref[...]     # [TN, M]
        gate = jnp.dot(hs_m, w1sb_ref[...],
                       preferred_element_type=f32) + b1sb_ref[...]   # [TN, M]
        fv = jnp.dot(hv_m, w1v_ref[...],
                     preferred_element_type=f32)                     # [3*TN, M]

        # --- equivariant gate activation (f32) ------------------------------
        s1 = s1 * jax.nn.sigmoid(s1)                       # SiLU on scalars
        sg = jax.nn.sigmoid(gate)                          # [TN, M]
        fv = (fv.reshape(3, tn, m) * sg[None]).reshape(3 * tn, m)

        # --- ff2 -------------------------------------------------------------
        o_s = jnp.dot(s1.astype(compute_dtype), w2s_ref[...],
                      preferred_element_type=f32) + b2s_ref[...]     # [TN, d_out]
        o_v = jnp.dot(fv.astype(compute_dtype), w2v_ref[...],
                      preferred_element_type=f32)                    # [3*TN, d_out]

        # dropout: identity

        if residual:          # static: d_out == d_in; skip is the NORMALIZED x
            o_s = o_s + hs
            o_v = o_v + hv_flat

        ys_ref[...] = o_s
        yv_ref[...] = o_v.reshape(3, tn, d_out)

    return kernel


# ------------------------------ wrapper ---------------------------------------
def _pick_row_tile(n, max_tile=256):
    if n <= max_tile:
        return n
    for t in (max_tile, 128, 64, 32, 16, 8):
        if n % t == 0:
            return t
    return n


def ffn_forward(x_s, x_v, params, d_mult, d_out, *,
                block_rows=None, use_bf16_matmul=True):
    """x_s: [B, N, C] f32 scalar irreps;  x_v: [B, N, C, 3] f32 vector irreps."""
    B, N, C = x_s.shape
    assert x_v.shape == (B, N, C, 3)
    M = d_mult * d_out
    residual = (d_out == C)
    cdt = jnp.bfloat16 if use_bf16_matmul else jnp.float32

    tn = block_rows if block_rows is not None else _pick_row_tile(N)
    assert N % tn == 0, "block_rows must divide N"

    x_v_k = jnp.transpose(x_v, (0, 3, 1, 2))               # [B, 3, N, C]

    # host-side weight prep: split ff1 scalar weight into (value, gate) halves,
    # cast matmul weights to the MXU compute dtype; biases / LN params stay f32.
    w1sa = params['w1_s'][:, :M].astype(cdt)
    w1sb = params['w1_s'][:, M:].astype(cdt)
    b1sa = params['b1_s'][:, :M]
    b1sb = params['b1_s'][:, M:]
    w1v = params['w1_v'].astype(cdt)
    w2s = params['w2_s'].astype(cdt)
    b2s = params['b2_s']
    w2v = params['w2_v'].astype(cdt)

    w_args = [params['ln_sg'], params['ln_sb'], params['ln_vg'],
              w1sa, b1sa, w1sb, b1sb, w1v, w2s, b2s, w2v]

    def wspec(a):
        nd = a.ndim
        return pl.BlockSpec(a.shape, lambda b, i, _nd=nd: (0,) * _nd)

    in_specs = [pl.BlockSpec((None, tn, C), lambda b, i: (b, i, 0)),
                pl.BlockSpec((None, 3, tn, C), lambda b, i: (b, 0, i, 0))]
    in_specs += [wspec(a) for a in w_args]

    out_shape = (jax.ShapeDtypeStruct((B, N, d_out), jnp.float32),
                 jax.ShapeDtypeStruct((B, 3, N, d_out), jnp.float32))
    out_specs = (pl.BlockSpec((None, tn, d_out), lambda b, i: (b, i, 0)),
                 pl.BlockSpec((None, 3, tn, d_out), lambda b, i: (b, 0, i, 0)))

    kernel = _make_ffn_kernel(tn, C, M, d_out, residual, cdt)

    y_s, y_v = pl.pallas_call(
        kernel,
        grid=(B, N // tn),
        in_specs=in_specs,
        out_specs=out_specs,
        out_shape=out_shape,
        compiler_params=pltpu.CompilerParams(
            dimension_semantics=("parallel", "parallel"),
            vmem_limit_bytes=32 * 1024 * 1024),
    )(x_s, x_v_k, *w_args)

    return y_s, jnp.transpose(y_v, (0, 2, 3, 1))           # back to [B, N, d_out, 3]


# ------------------------------ pure-JAX reference -----------------------------
def _quantize(x, dtype):
    """Emulate MXU operand quantization (bf16 operands, f32 accumulate) without
    issuing mixed-precision dots — these are rejected by the CPU DotThunk."""
    if dtype == jnp.float32:
        return x
    return x.astype(dtype).astype(jnp.float32)


def ffn_reference(x_s, x_v, params, d_mult, d_out, compute_dtype=jnp.float32):
    f32 = jnp.float32
    C = x_s.shape[-1]
    M = d_mult * d_out

    mu = jnp.mean(x_s, axis=-1, keepdims=True)
    var = jnp.mean((x_s - mu) ** 2, axis=-1, keepdims=True)
    hs = (x_s - mu) * lax.rsqrt(var + 1e-5) * params['ln_sg'] + params['ln_sb']

    n2 = jnp.sum(x_v * x_v, axis=-1)                        # [B, N, C]
    inv = lax.rsqrt(jnp.mean(n2, axis=-1, keepdims=True) + 1e-5)
    hv = x_v * inv[..., None] * params['ln_vg'][0][None, None, :, None]

    # bf16 round-trip on every matmul operand, then plain f32 dots/einsums.
    w1sa = _quantize(params['w1_s'][:, :M], compute_dtype)
    w1sb = _quantize(params['w1_s'][:, M:], compute_dtype)
    w1v = _quantize(params['w1_v'], compute_dtype)
    w2s = _quantize(params['w2_s'], compute_dtype)
    w2v = _quantize(params['w2_v'], compute_dtype)

    hs_m = _quantize(hs, compute_dtype)
    hv_m = _quantize(hv, compute_dtype)

    s1 = jnp.dot(hs_m, w1sa, preferred_element_type=f32) + params['b1_s'][:, :M]
    gate = jnp.dot(hs_m, w1sb, preferred_element_type=f32) + params['b1_s'][:, M:]
    fv = jnp.einsum('bncx,cm->bnmx', hv_m, w1v, preferred_element_type=f32)

    s1 = s1 * jax.nn.sigmoid(s1)
    fv = fv * jax.nn.sigmoid(gate)[..., None]

    o_s = jnp.dot(_quantize(s1, compute_dtype), w2s,
                  preferred_element_type=f32) + params['b2_s']
    o_v = jnp.einsum('bnmx,md->bndx', _quantize(fv, compute_dtype), w2v,
                     preferred_element_type=f32)

    if d_out == C:
        o_s = o_s + hs
        o_v = o_v + hv
    return o_s, o_v


# ------------------------------ parameter init ---------------------------------
def init_params(key, d_in, d_mult, d_out):
    # NOTE: random weights for a non-trivial compute path; the reference
    # module's init_type='zero' on ff2 is an init detail only.
    m = d_mult * d_out
    keys = iter(jax.random.split(key, 16))

    def w(shape, scale=0.2):
        return scale * jax.random.normal(next(keys), shape, jnp.float32)

    p = {}
    p['ln_sg'] = 1.0 + w((1, d_in), 0.1)
    p['ln_sb'] = w((1, d_in), 0.1)
    p['ln_vg'] = 1.0 + w((1, d_in), 0.1)
    p['w1_s'] = w((d_in, 2 * m))
    p['b1_s'] = w((1, 2 * m), 0.05)
    p['w1_v'] = w((d_in, m))
    p['w2_s'] = w((m, d_out))
    p['b2_s'] = w((1, d_out), 0.05)
    p['w2_v'] = w((m, d_out))
    return p


# ------------------------------ main --------------------------------------------
if __name__ == "__main__":
    B, N, D_IN, D_MULT = 2, 64, 32, 2
    D_OUT = D_IN                                  # exercises the residual path

    key = jax.random.PRNGKey(0)
    k_s, k_v, k_p = jax.random.split(key, 3)
    x_s = jax.random.normal(k_s, (B, N, D_IN), jnp.float32)
    x_v = jax.random.normal(k_v, (B, N, D_IN, 3), jnp.float32)
    params = init_params(k_p, D_IN, D_MULT, D_OUT)

    # Pallas kernel (bf16 operands at the MXU, f32 accumulation / elementwise).
    y_s, y_v = ffn_forward(x_s, x_v, params, D_MULT, D_OUT,
                           block_rows=32, use_bf16_matmul=True)
    jax.block_until_ready((y_s, y_v))

    assert y_s.shape == (B, N, D_OUT)
    assert y_v.shape == (B, N, D_OUT, 3)
    assert bool(jnp.all(jnp.isfinite(y_s))) and bool(jnp.all(jnp.isfinite(y_v)))

    # Correctness vs. a pure-JAX reference that emulates the same bf16 operand
    # quantization with f32 accumulation (backend-portable: no bf16 dots).
    r_s, r_v = ffn_reference(x_s, x_v, params, D_MULT, D_OUT,
                             compute_dtype=jnp.bfloat16)
    assert jnp.allclose(y_s, r_s, rtol=1e-2, atol=1e-2), \
        float(jnp.max(jnp.abs(y_s - r_s)))
    assert jnp.allclose(y_v, r_v, rtol=1e-2, atol=1e-2), \
        float(jnp.max(jnp.abs(y_v - r_v)))

    print("KERNEL_OK")
</pallas_src>

<mosaic_0001>
module attributes {stable_mosaic.version = 11 : i64} {
  func.func @kernel(%arg0: i32, %arg1: i32, %arg2: memref<1x32x32xf32, #tpu.memory_space<vmem>>, %arg3: memref<1x3x32x32xf32, #tpu.memory_space<vmem>>, %arg4: memref<1x32xf32, #tpu.memory_space<vmem>>, %arg5: memref<1x32xf32, #tpu.memory_space<vmem>>, %arg6: memref<1x32xf32, #tpu.memory_space<vmem>>, %arg7: memref<32x64xbf16, #tpu.memory_space<vmem>>, %arg8: memref<1x64xf32, #tpu.memory_space<vmem>>, %arg9: memref<32x64xbf16, #tpu.memory_space<vmem>>, %arg10: memref<1x64xf32, #tpu.memory_space<vmem>>, %arg11: memref<32x64xbf16, #tpu.memory_space<vmem>>, %arg12: memref<64x32xbf16, #tpu.memory_space<vmem>>, %arg13: memref<1x32xf32, #tpu.memory_space<vmem>>, %arg14: memref<64x32xbf16, #tpu.memory_space<vmem>>, %arg15: memref<1x32x32xf32, #tpu.memory_space<vmem>>, %arg16: memref<1x3x32x32xf32, #tpu.memory_space<vmem>>) attributes {dimension_semantics = [#tpu.dimension_semantics<parallel>, #tpu.dimension_semantics<parallel>], iteration_bounds = array<i64: 2, 2>, scalar_prefetch = 0 : i64, scratch_operands = 0 : i64, tpu.core_type = #tpu.core_type<tc>, window_params = [{transform_indices = @transform_0, window_bounds = array<i64: 1, 32, 32>}, {transform_indices = @transform_1, window_bounds = array<i64: 1, 3, 32, 32>}, {pipeline_mode = #tpu.pipeline_mode<synchronous>, transform_indices = @transform_2, window_bounds = array<i64: 1, 32>}, {pipeline_mode = #tpu.pipeline_mode<synchronous>, transform_indices = @transform_3, window_bounds = array<i64: 1, 32>}, {pipeline_mode = #tpu.pipeline_mode<synchronous>, transform_indices = @transform_4, window_bounds = array<i64: 1, 32>}, {pipeline_mode = #tpu.pipeline_mode<synchronous>, transform_indices = @transform_5, window_bounds = array<i64: 32, 64>}, {pipeline_mode = #tpu.pipeline_mode<synchronous>, transform_indices = @transform_6, window_bounds = array<i64: 1, 64>}, {pipeline_mode = #tpu.pipeline_mode<synchronous>, transform_indices = @transform_7, window_bounds = array<i64: 32, 64>}, {pipeline_mode = #tpu.pipeline_mode<synchronous>, transform_indices = @transform_8, window_bounds = array<i64: 1, 64>}, {pipeline_mode = #tpu.pipeline_mode<synchronous>, transform_indices = @transform_9, window_bounds = array<i64: 32, 64>}, {pipeline_mode = #tpu.pipeline_mode<synchronous>, transform_indices = @transform_10, window_bounds = array<i64: 64, 32>}, {pipeline_mode = #tpu.pipeline_mode<synchronous>, transform_indices = @transform_11, window_bounds = array<i64: 1, 32>}, {pipeline_mode = #tpu.pipeline_mode<synchronous>, transform_indices = @transform_12, window_bounds = array<i64: 64, 32>}, {transform_indices = @transform_13, window_bounds = array<i64: 1, 32, 32>}, {transform_indices = @transform_14, window_bounds = array<i64: 1, 3, 32, 32>}]} {
    %c0 = arith.constant 0 : index
    %c0_0 = arith.constant 0 : index
    %c0_1 = arith.constant 0 : index
    %0 = vector.load %arg2[%c0, %c0_0, %c0_1] : memref<1x32x32xf32, #tpu.memory_space<vmem>>, vector<1x32x32xf32>
    %1 = vector.shape_cast %0 : vector<1x32x32xf32> to vector<32x32xf32>
    %c0_2 = arith.constant 0 : index
    %c0_3 = arith.constant 0 : index
    %c0_4 = arith.constant 0 : index
    %c0_5 = arith.constant 0 : index
    %2 = vector.load %arg3[%c0_2, %c0_3, %c0_4, %c0_5] : memref<1x3x32x32xf32, #tpu.memory_space<vmem>>, vector<1x3x32x32xf32>
    %3 = vector.shape_cast %2 : vector<1x3x32x32xf32> to vector<3x32x32xf32>
    %cst = arith.constant dense<0.000000e+00> : vector<32xf32>
    %4 = vector.multi_reduction <add>, %1, %cst [1] : vector<32x32xf32> to vector<32xf32>
    %5 = vector.shape_cast %4 : vector<32xf32> to vector<32x1xf32>
    %cst_6 = arith.constant 3.200000e+01 : f32
    %6 = vector.broadcast %cst_6 : f32 to vector<32x1xf32>
    %7 = arith.divf %5, %6 : vector<32x1xf32>
    %8 = vector.broadcast %7 : vector<32x1xf32> to vector<32x32xf32>
    %9 = arith.subf %1, %8 : vector<32x32xf32>
    %10 = arith.mulf %9, %9 : vector<32x32xf32>
    %cst_7 = arith.constant dense<0.000000e+00> : vector<32xf32>
    %11 = vector.multi_reduction <add>, %10, %cst_7 [1] : vector<32x32xf32> to vector<32xf32>
    %12 = vector.shape_cast %11 : vector<32xf32> to vector<32x1xf32>
    %cst_8 = arith.constant 3.200000e+01 : f32
    %13 = vector.broadcast %cst_8 : f32 to vector<32x1xf32>
    %14 = arith.divf %12, %13 : vector<32x1xf32>
    %15 = vector.broadcast %7 : vector<32x1xf32> to vector<32x32xf32>
    %16 = arith.subf %1, %15 : vector<32x32xf32>
    %cst_9 = arith.constant 9.99999974E-6 : f32
    %17 = vector.broadcast %cst_9 : f32 to vector<32x1xf32>
    %18 = arith.addf %14, %17 : vector<32x1xf32>
    %19 = math.rsqrt %18 : vector<32x1xf32>
    %20 = vector.broadcast %19 : vector<32x1xf32> to vector<32x32xf32>
    %21 = arith.mulf %16, %20 : vector<32x32xf32>
    %c0_10 = arith.constant 0 : index
    %c0_11 = arith.constant 0 : index
    %22 = vector.load %arg4[%c0_10, %c0_11] : memref<1x32xf32, #tpu.memory_space<vmem>>, vector<1x32xf32>
    %23 = vector.broadcast %22 : vector<1x32xf32> to vector<32x32xf32>
    %24 = arith.mulf %21, %23 : vector<32x32xf32>
    %c0_12 = arith.constant 0 : index
    %c0_13 = arith.constant 0 : index
    %25 = vector.load %arg5[%c0_12, %c0_13] : memref<1x32xf32, #tpu.memory_space<vmem>>, vector<1x32xf32>
    %26 = vector.broadcast %25 : vector<1x32xf32> to vector<32x32xf32>
    %27 = arith.addf %24, %26 : vector<32x32xf32>
    %28 = arith.mulf %3, %3 : vector<3x32x32xf32>
    %cst_14 = arith.constant dense<0.000000e+00> : vector<32x32xf32>
    %29 = vector.multi_reduction <add>, %28, %cst_14 [0] : vector<3x32x32xf32> to vector<32x32xf32>
    %cst_15 = arith.constant dense<0.000000e+00> : vector<32xf32>
    %30 = vector.multi_reduction <add>, %29, %cst_15 [1] : vector<32x32xf32> to vector<32xf32>
    %31 = vector.shape_cast %30 : vector<32xf32> to vector<32x1xf32>
    %cst_16 = arith.constant 3.200000e+01 : f32
    %32 = vector.broadcast %cst_16 : f32 to vector<32x1xf32>
    %33 = arith.divf %31, %32 : vector<32x1xf32>
    %cst_17 = arith.constant 9.99999974E-6 : f32
    %34 = vector.broadcast %cst_17 : f32 to vector<32x1xf32>
    %35 = arith.addf %33, %34 : vector<32x1xf32>
    %36 = math.rsqrt %35 : vector<32x1xf32>
    %37 = vector.shape_cast %36 : vector<32x1xf32> to vector<1x32x1xf32>
    %38 = vector.broadcast %37 : vector<1x32x1xf32> to vector<3x32x32xf32>
    %39 = arith.mulf %3, %38 : vector<3x32x32xf32>
    %c0_18 = arith.constant 0 : index
    %c0_19 = arith.constant 0 : index
    %40 = vector.load %arg6[%c0_18, %c0_19] : memref<1x32xf32, #tpu.memory_space<vmem>>, vector<1x32xf32>
    %41 = vector.shape_cast %40 : vector<1x32xf32> to vector<1x1x32xf32>
    %42 = vector.broadcast %41 : vector<1x1x32xf32> to vector<3x32x32xf32>
    %43 = arith.mulf %39, %42 : vector<3x32x32xf32>
    %44 = vector.shape_cast %43 : vector<3x32x32xf32> to vector<96x32xf32>
    %45 = arith.truncf %27 : vector<32x32xf32> to vector<32x32xbf16>
    %46 = arith.truncf %44 : vector<96x32xf32> to vector<96x32xbf16>
    %c0_20 = arith.constant 0 : index
    %c0_21 = arith.constant 0 : index
    %47 = vector.load %arg7[%c0_20, %c0_21] : memref<32x64xbf16, #tpu.memory_space<vmem>>, vector<32x64xbf16>
    %cst_22 = arith.constant dense<0.000000e+00> : vector<32x64xf32>
    %48 = tpu.matmul %45, %47, %cst_22 {dimension_numbers = #tpu.dot_dimension_numbers<[1], [0], [0], [1], [0, 0, 1, 1], [], []>} : vector<32x32xbf16>, vector<32x64xbf16>, vector<32x64xf32> -> vector<32x64xf32>
    %c0_23 = arith.constant 0 : index
    %c0_24 = arith.constant 0 : index
    %49 = vector.load %arg8[%c0_23, %c0_24] : memref<1x64xf32, #tpu.memory_space<vmem>>, vector<1x64xf32>
    %50 = vector.broadcast %49 : vector<1x64xf32> to vector<32x64xf32>
    %51 = arith.addf %48, %50 : vector<32x64xf32>
    %c0_25 = arith.constant 0 : index
    %c0_26 = arith.constant 0 : index
    %52 = vector.load %arg9[%c0_25, %c0_26] : memref<32x64xbf16, #tpu.memory_space<vmem>>, vector<32x64xbf16>
    %cst_27 = arith.constant dense<0.000000e+00> : vector<32x64xf32>
    %53 = tpu.matmul %45, %52, %cst_27 {dimension_numbers = #tpu.dot_dimension_numbers<[1], [0], [0], [1], [0, 0, 1, 1], [], []>} : vector<32x32xbf16>, vector<32x64xbf16>, vector<32x64xf32> -> vector<32x64xf32>
    %c0_28 = arith.constant 0 : index
    %c0_29 = arith.constant 0 : index
    %54 = vector.load %arg10[%c0_28, %c0_29] : memref<1x64xf32, #tpu.memory_space<vmem>>, vector<1x64xf32>
    %55 = vector.broadcast %54 : vector<1x64xf32> to vector<32x64xf32>
    %56 = arith.addf %53, %55 : vector<32x64xf32>
    %c0_30 = arith.constant 0 : index
    %c0_31 = arith.constant 0 : index
    %57 = vector.load %arg11[%c0_30, %c0_31] : memref<32x64xbf16, #tpu.memory_space<vmem>>, vector<32x64xbf16>
    %cst_32 = arith.constant dense<0.000000e+00> : vector<96x64xf32>
    %58 = tpu.matmul %46, %57, %cst_32 {dimension_numbers = #tpu.dot_dimension_numbers<[1], [0], [0], [1], [0, 0, 1, 1], [], []>} : vector<96x32xbf16>, vector<32x64xbf16>, vector<96x64xf32> -> vector<96x64xf32>
    %59 = arith.negf %51 : vector<32x64xf32>
    %60 = math.exp %59 : vector<32x64xf32>
    %cst_33 = arith.constant 1.000000e+00 : f32
    %61 = vector.broadcast %cst_33 : f32 to vector<32x64xf32>
    %62 = arith.addf %61, %60 : vector<32x64xf32>
    %63 = arith.divf %61, %62 : vector<32x64xf32>
    %64 = arith.mulf %51, %63 : vector<32x64xf32>
    %65 = arith.negf %56 : vector<32x64xf32>
    %66 = math.exp %65 : vector<32x64xf32>
    %cst_34 = arith.constant 1.000000e+00 : f32
    %67 = vector.broadcast %cst_34 : f32 to vector<32x64xf32>
    %68 = arith.addf %67, %66 : vector<32x64xf32>
    %69 = arith.divf %67, %68 : vector<32x64xf32>
    %70 = vector.shape_cast %58 : vector<96x64xf32> to vector<3x32x64xf32>
    %71 = vector.shape_cast %69 : vector<32x64xf32> to vector<1x32x64xf32>
    %72 = vector.broadcast %71 : vector<1x32x64xf32> to vector<3x32x64xf32>
    %73 = arith.mulf %70, %72 : vector<3x32x64xf32>
    %74 = vector.shape_cast %73 : vector<3x32x64xf32> to vector<96x64xf32>
    %75 = arith.truncf %64 : vector<32x64xf32> to vector<32x64xbf16>
    %c0_35 = arith.constant 0 : index
    %c0_36 = arith.constant 0 : index
    %76 = vector.load %arg12[%c0_35, %c0_36] : memref<64x32xbf16, #tpu.memory_space<vmem>>, vector<64x32xbf16>
    %cst_37 = arith.constant dense<0.000000e+00> : vector<32x32xf32>
    %77 = tpu.matmul %75, %76, %cst_37 {dimension_numbers = #tpu.dot_dimension_numbers<[1], [0], [0], [1], [0, 0, 1, 1], [], []>} : vector<32x64xbf16>, vector<64x32xbf16>, vector<32x32xf32> -> vector<32x32xf32>
    %c0_38 = arith.constant 0 : index
    %c0_39 = arith.constant 0 : index
    %78 = vector.load %arg13[%c0_38, %c0_39] : memref<1x32xf32, #tpu.memory_space<vmem>>, vector<1x32xf32>
    %79 = vector.broadcast %78 : vector<1x32xf32> to vector<32x32xf32>
    %80 = arith.addf %77, %79 : vector<32x32xf32>
    %81 = arith.truncf %74 : vector<96x64xf32> to vector<96x64xbf16>
    %c0_40 = arith.constant 0 : index
    %c0_41 = arith.constant 0 : index
    %82 = vector.load %arg14[%c0_40, %c0_41] : memref<64x32xbf16, #tpu.memory_space<vmem>>, vector<64x32xbf16>
    %cst_42 = arith.constant dense<0.000000e+00> : vector<96x32xf32>
    %83 = tpu.matmul %81, %82, %cst_42 {dimension_numbers = #tpu.dot_dimension_numbers<[1], [0], [0], [1], [0, 0, 1, 1], [], []>} : vector<96x64xbf16>, vector<64x32xbf16>, vector<96x32xf32> -> vector<96x32xf32>
    %84 = arith.addf %80, %27 : vector<32x32xf32>
    %85 = arith.addf %83, %44 : vector<96x32xf32>
    %c0_43 = arith.constant 0 : index
    %c0_44 = arith.constant 0 : index
    %c0_45 = arith.constant 0 : index
    %86 = vector.load %arg15[%c0_43, %c0_44, %c0_45] : memref<1x32x32xf32, #tpu.memory_space<vmem>>, vector<1x32x32xf32>
    %87 = vector.shape_cast %86 : vector<1x32x32xf32> to vector<32x32xf32>
    %88 = vector.shape_cast %84 : vector<32x32xf32> to vector<1x32x32xf32>
    tpu.vector_store %arg15[%c0_43, %c0_44, %c0_45], %88 {strides = array<i32>} : memref<1x32x32xf32, #tpu.memory_space<vmem>>, vector<1x32x32xf32>,
    %89 = vector.shape_cast %85 : vector<96x32xf32> to vector<3x32x32xf32>
    %c0_46 = arith.constant 0 : index
    %c0_47 = arith.constant 0 : index
    %c0_48 = arith.constant 0 : index
    %c0_49 = arith.constant 0 : index
    %90 = vector.load %arg16[%c0_46, %c0_47, %c0_48, %c0_49] : memref<1x3x32x32xf32, #tpu.memory_space<vmem>>, vector<1x3x32x32xf32>
    %91 = vector.shape_cast %90 : vector<1x3x32x32xf32> to vector<3x32x32xf32>
    %92 = vector.shape_cast %89 : vector<3x32x32xf32> to vector<1x3x32x32xf32>
    tpu.vector_store %arg16[%c0_46, %c0_47, %c0_48, %c0_49], %92 {strides = array<i32>} : memref<1x3x32x32xf32, #tpu.memory_space<vmem>>, vector<1x3x32x32xf32>,
    return
  }
  func.func @transform_0(%arg0: i32, %arg1: i32) -> (i32, i32, i32) {
    %c0_i32 = arith.constant 0 : i32
    %c0_i32_0 = arith.constant 0 : i32
    return %arg0, %arg1, %c0_i32 : i32, i32, i32
  }
  func.func @transform_1(%arg0: i32, %arg1: i32) -> (i32, i32, i32, i32) {
    %c0_i32 = arith.constant 0 : i32
    %c0_i32_0 = arith.constant 0 : i32
    %c0_i32_1 = arith.constant 0 : i32
    return %arg0, %c0_i32, %arg1, %c0_i32_0 : i32, i32, i32, i32
  }
  func.func @transform_2(%arg0: i32, %arg1: i32) -> (i32, i32) {
    %c0_i32 = arith.constant 0 : i32
    %c0_i32_0 = arith.constant 0 : i32
    %c0_i32_1 = arith.constant 0 : i32
    return %c0_i32, %c0_i32_0 : i32, i32
  }
  func.func @transform_3(%arg0: i32, %arg1: i32) -> (i32, i32) {
    %c0_i32 = arith.constant 0 : i32
    %c0_i32_0 = arith.constant 0 : i32
    %c0_i32_1 = arith.constant 0 : i32
    return %c0_i32, %c0_i32_0 : i32, i32
  }
  func.func @transform_4(%arg0: i32, %arg1: i32) -> (i32, i32) {
    %c0_i32 = arith.constant 0 : i32
    %c0_i32_0 = arith.constant 0 : i32
    %c0_i32_1 = arith.constant 0 : i32
    return %c0_i32, %c0_i32_0 : i32, i32
  }
  func.func @transform_5(%arg0: i32, %arg1: i32) -> (i32, i32) {
    %c0_i32 = arith.constant 0 : i32
    %c0_i32_0 = arith.constant 0 : i32
    %c0_i32_1 = arith.constant 0 : i32
    return %c0_i32, %c0_i32_0 : i32, i32
  }
  func.func @transform_6(%arg0: i32, %arg1: i32) -> (i32, i32) {
    %c0_i32 = arith.constant 0 : i32
    %c0_i32_0 = arith.constant 0 : i32
    %c0_i32_1 = arith.constant 0 : i32
    return %c0_i32, %c0_i32_0 : i32, i32
  }
  func.func @transform_7(%arg0: i32, %arg1: i32) -> (i32, i32) {
    %c0_i32 = arith.constant 0 : i32
    %c0_i32_0 = arith.constant 0 : i32
    %c0_i32_1 = arith.constant 0 : i32
    return %c0_i32, %c0_i32_0 : i32, i32
  }
  func.func @transform_8(%arg0: i32, %arg1: i32) -> (i32, i32) {
    %c0_i32 = arith.constant 0 : i32
    %c0_i32_0 = arith.constant 0 : i32
    %c0_i32_1 = arith.constant 0 : i32
    return %c0_i32, %c0_i32_0 : i32, i32
  }
  func.func @transform_9(%arg0: i32, %arg1: i32) -> (i32, i32) {
    %c0_i32 = arith.constant 0 : i32
    %c0_i32_0 = arith.constant 0 : i32
    %c0_i32_1 = arith.constant 0 : i32
    return %c0_i32, %c0_i32_0 : i32, i32
  }
  func.func @transform_10(%arg0: i32, %arg1: i32) -> (i32, i32) {
    %c0_i32 = arith.constant 0 : i32
    %c0_i32_0 = arith.constant 0 : i32
    %c0_i32_1 = arith.constant 0 : i32
    return %c0_i32, %c0_i32_0 : i32, i32
  }
  func.func @transform_11(%arg0: i32, %arg1: i32) -> (i32, i32) {
    %c0_i32 = arith.constant 0 : i32
    %c0_i32_0 = arith.constant 0 : i32
    %c0_i32_1 = arith.constant 0 : i32
    return %c0_i32, %c0_i32_0 : i32, i32
  }
  func.func @transform_12(%arg0: i32, %arg1: i32) -> (i32, i32) {
    %c0_i32 = arith.constant 0 : i32
    %c0_i32_0 = arith.constant 0 : i32
    %c0_i32_1 = arith.constant 0 : i32
    return %c0_i32, %c0_i32_0 : i32, i32
  }
  func.func @transform_13(%arg0: i32, %arg1: i32) -> (i32, i32, i32) {
    %c0_i32 = arith.constant 0 : i32
    %c0_i32_0 = arith.constant 0 : i32
    return %arg0, %arg1, %c0_i32 : i32, i32, i32
  }
  func.func @transform_14(%arg0: i32, %arg1: i32) -> (i32, i32, i32, i32) {
    %c0_i32 = arith.constant 0 : i32
    %c0_i32_0 = arith.constant 0 : i32
    %c0_i32_1 = arith.constant 0 : i32
    return %arg0, %c0_i32, %arg1, %c0_i32_0 : i32, i32, i32, i32
  }
}

</mosaic_0001>

<bundles_post_ra>
// kernel: tpu_custom_call.1
= control target key start
LH: loop header
LB: loop body
LE: loop exit
PB: predicated region body
PF: predicated region fallthrough
CT: control target
= control target key end

     0   :  { %s2666_s0 = inlined_call_operand.vmem [shape: f32[2,64,32], index: 0, kind: input, shape index: {}]   ;;  %s2667_s1 = inlined_call_operand.vmem [shape: f32[2,3,64,32], index: 1, kind: input, shape index: {}]   ;;  %s2668_s2 = inlined_call_operand.vmem [shape: f32[1,32], index: 2, kind: input, shape index: {}]   ;;  %s2669_s3 = inlined_call_operand.vmem [shape: f32[1,32], index: 3, kind: input, shape index: {}]   ;;  %s2670_s4 = inlined_call_operand.vmem [shape: f32[1,32], index: 4, kind: input, shape index: {}]   ;;  %s2671_s5 = inlined_call_operand.vmem [shape: bf16[32,64], index: 5, kind: input, shape index: {}]   ;;  %s2672_s6 = inlined_call_operand.vmem [shape: f32[1,64], index: 6, kind: input, shape index: {}]   ;;  %s2673_s7 = inlined_call_operand.vmem [shape: bf16[32,64], index: 7, kind: input, shape index: {}]   ;;  %s2674_s8 = inlined_call_operand.vmem [shape: f32[1,64], index: 8, kind: input, shape index: {}]   ;;  %s2675_s9 = inlined_call_operand.vmem [shape: bf16[32,64], index: 9, kind: input, shape index: {}]   ;;  %s2676_s10 = inlined_call_operand.vmem [shape: bf16[64,32], index: 10, kind: input, shape index: {}]   ;;  %s2677_s11 = inlined_call_operand.vmem [shape: f32[1,32], index: 11, kind: input, shape index: {}]   ;;  %s2678_s12 = inlined_call_operand.vmem [shape: bf16[64,32], index: 12, kind: input, shape index: {}]   ;;  %s2679_s13 = inlined_call_operand.vmem [shape: f32[2,64,32], index: 13, kind: output, shape index: {0}]   ;;  %s2680_s14 = inlined_call_operand.vmem [shape: f32[2,3,64,32], index: 14, kind: output, shape index: {1}]  }
   0x1   :  { %2685 = sst [smem:[#allocation7_spill]] %s2676_s10 }
   0x2   :  { %2686 = sst [smem:[#allocation8_spill]] %s2677_s11 }
   0x3   :  { %2687 = sst [smem:[#allocation9_spill]] %s2679_s13 }
   0x4   :  { %2688 = sst [smem:[#allocation10_spill]] %s2680_s14 }
   0x5   :  { %s1984_s29 = smov 0   ;;  %s1986_s30 = smov 0  }
   0x6   :  { %s1988_s15 = smov 0   ;;  %s1990_s16 = smov 0  }
   0x7   :  { %s1992_s17 = smov 0   ;;  %s1994_s18 = smov 0  }
   0x8   :  { %s1996_s19 = smov 0  }
   0x9 LB: > { %s34_s20 = sadd.s32 1, %s1898_s17  ;;  %s37_s21 = sadd.s32 1, %s1902_s18  ;;  %s1906_s19 = sphi %s1996_s19, %s25_s19   ;;  %s1902_s18 = sphi %s1994_s18, %s2722_s18   ;;  %s1898_s17 = sphi %s1992_s17, %s2721_s17   ;;  %s1894_s16 = sphi %s1990_s16, %s2720_s16   ;;  %s1890_s15 = sphi %s1988_s15, %s2719_s15   ;;  %s1886_s30 = sphi %s1986_s30, %s2718_s30   ;;  %s1882_s29 = sphi %s1984_s29, %s2717_s29  }
   0xa   : > { %p35_p0 = scmp.ge.s32.totalorder %s34_s20, 2  ;;  %s1614_s22 = sadd.s32 4294967295, %s1906_s19  }
   0xb   : > { %p81_p1 = scmp.ne.s32.totalorder %s1886_s30, %s1882_s29  ;;  %p82_p2 = scmp.eq.s32.totalorder %s1906_s19, 0 }
   0xc   : > { %s2724_s20 = smov (%p35_p0, %s34_s20), 0  ;;  %s2726_s21 = smov (!%p35_p0, %s37_s21), %s1902_s18 }
   0xd   : > { %2689 = sst [smem:[#allocation4_spill]] %s2724_s20  ;;  %p39_p3 = scmp.ge.s32.totalorder %s2726_s21, 2 }
   0xe   : > { %p372_p4 = scmp.eq.s32.totalorder %s1614_s22, 3  ;;  %s70_s23 = ssub.s32 %s1898_s17, %s2724_s20 }
   0xf   : > { %p83_p5 = por %p82_p2, %p81_p1  ;;  %s2728_s21 = smov (%p39_p3, %s2726_s21), 0 }
  0x10   : > { %2690 = sst [smem:[#allocation5_spill]] %s2728_s21  ;;  %p2032_p6 = por %p372_p4, %p81_p1 }
  0x11   : > { %s69_s25 = ssub.s32 %s1902_s18, %s2728_s21  ;;  %s74_s27 = sadd.s32 1, %s1886_s30 }
  0x12   : > { %s2691_s24 = scalar_select %p2032_p6, 1, 0 }
  0x13   : > { %s71_s26 = sor.u32 %s70_s23, %s69_s25  ;;  %p1617_p8 = scmp.ge.s32.totalorder %s1906_s19, 4 }
  0x14   : > { %2692 = sst [smem:[#allocation6_spill]] %s2691_s24  ;;  %p72_p7 = scmp.eq.s32.totalorder %s71_s26, 0 }
  0x15   : > { %427 = sbr.rel (%p1617_p8) target bundleno = 46 (0x2e), region = 60 }
  0x16   : > { %s2040_s28 = scalar_select %p72_p7, %s1886_s30, %s74_s27  }
  0x1a   : > { %443 = sbr.rel (!%p83_p5) target bundleno = 46 (0x2e), region = 68  ;;  %s445_s22 = sand.u32 (%p83_p5), 1, %s1886_s30  }
  0x1b   : > { %s1735_s20 = smul.u32 (%p83_p5), 96, %s445_s22  ;;  %s1618_s14 = sshll.u32 (%p83_p5), %s1898_s17, 2 }
  0x1c   : > { %s1736_s13 = smul.u32 (%p83_p5), 24, %s1902_s18 }
  0x1d   : > { %s447_s25 = scalar_lea.vmem (%p83_p5), [#allocation2], %s1735_s20 }
  0x1e   : > { %s450_s11 = sadd.s32 (%p83_p5), %s1736_s13, %s1618_s14 }
  0x1f   : > { %s1619_s10 = sshll.u32 %s450_s11, 3 }
  0x20   : > { %s452_s23 = scalar_lea.vmem %s2667_s1, %s1619_s10 }
  0x21   : > { %v503_v0 = vld [vmem:[%s452_s23] sm:$0xff]  ;;  %v505_v1 = vld [vmem:[%s452_s23 + $0x8] sm:$0xff]  ;;  %v507_v2 = vld [vmem:[%s452_s23 + $0x10] sm:$0xff] }
  0x22   : > { %504 = vst [vmem:[%s447_s25] sm:$0xff] %v503_v0  ;;  %v509_v3 = vld [vmem:[%s452_s23 + $0x18] sm:$0xff]  ;;  %v511_v4 = vld [vmem:[%s452_s23 + $0x40] sm:$0xff]  ;;  %v513_v5 = vld [vmem:[%s452_s23 + $0x48] sm:$0xff] }
  0x23   : > { %506 = vst [vmem:[%s447_s25 + $0x8] sm:$0xff] %v505_v1  ;;  %v515_v6 = vld [vmem:[%s452_s23 + $0x50] sm:$0xff]  ;;  %v517_v7 = vld [vmem:[%s452_s23 + $0x58] sm:$0xff]  ;;  %v519_v8 = vld [vmem:[%s452_s23 + $0x80] sm:$0xff] }
  0x24   : > { %508 = vst [vmem:[%s447_s25 + $0x10] sm:$0xff] %v507_v2  ;;  %v521_v9 = vld [vmem:[%s452_s23 + $0x88] sm:$0xff]  ;;  %v523_v10 = vld [vmem:[%s452_s23 + $0x90] sm:$0xff]  ;;  %v525_v11 = vld [vmem:[%s452_s23 + $0x98] sm:$0xff] }
  0x25   : > { %510 = vst [vmem:[%s447_s25 + $0x18] sm:$0xff] %v509_v3 }
  0x26   : > { %512 = vst [vmem:[%s447_s25 + $0x20] sm:$0xff] %v511_v4 }
  0x27   : > { %514 = vst [vmem:[%s447_s25 + $0x28] sm:$0xff] %v513_v5 }
  0x28   : > { %516 = vst [vmem:[%s447_s25 + $0x30] sm:$0xff] %v515_v6 }
  0x29   : > { %518 = vst [vmem:[%s447_s25 + $0x38] sm:$0xff] %v517_v7 }
  0x2a   : > { %520 = vst [vmem:[%s447_s25 + $0x40] sm:$0xff] %v519_v8 }
  0x2b   : > { %522 = vst [vmem:[%s447_s25 + $0x48] sm:$0xff] %v521_v9 }
  0x2c   : > { %524 = vst [vmem:[%s447_s25 + $0x50] sm:$0xff] %v523_v10 }
  0x2d   : > { %526 = vst [vmem:[%s447_s25 + $0x58] sm:$0xff] %v525_v11 }
  0x2e PF: > { %p1620_p9 = scmp.ge.s32.totalorder %s1906_s19, 1  ;;  %p531_p10 = scmp.lt.s32.totalorder %s1906_s19, 5 }
  0x30   : > { %p532_p11 = pnand %p1620_p9, %p531_p10 }
  0x31   : > { %s2052_s10 = sshll.u32 (!%p532_p11), %s1890_s15, 2  ;;  %p601_p12 = scmp.lt.s32.totalorder (!%p532_p11), %s1894_s16, 1 }
  0x32   : > { %535 = sbr.rel (%p532_p11) target bundleno = 704 (0x2c0), region = 106  ;;  %p603_p13 = scmp.lt.s32.totalorder (!%p532_p11), %s2052_s10, 7 }
  0x33   : > { %s538_s11 = sand.u32 (!%p532_p11), 1, %s1882_s29   ;;  %s2695_s15 = sld [smem:[#allocation7_spill]] (!%p532_p11) }
  0x34   : > { %s2059_s21 = smul.u32 (!%p532_p11), 96, %s538_s11 }
  0x36   : > { %s2070_s23 = scalar_lea.vmem (!%p532_p11), [#allocation2], %s2059_s21 }
  0x37   : > { %s602_s13 = scalar_select %p601_p12, %s1894_s16, 1  ;;  %vm639_vm0 = vcmask 261120   ;;  %v2073_v12 = vld [vmem:[%s2070_s23] sm:$0xff]  ;;  %v2096_v22 = vld [vmem:[%s2070_s23 + $0x8] sm:$0xff]  ;;  %v2127_v44 = vld [vmem:[%s2070_s23 + $0x10] sm:$0xff]  ;;  %v1908_v54 = vmov 32.0  }
  0x38   : > { %s604_s14 = scalar_select %p603_p13, %s2052_s10, 7  ;;  %v2076_v13 = vld [vmem:[%s2070_s23 + $0x20] sm:$0xff]  ;;  %v751_v17 = vmul.f32 %v2073_v12, %v2073_v12  ;;  %v2099_v23 = vld [vmem:[%s2070_s23 + $0x28] sm:$0xff]  ;;  %v752_v29 = vmul.f32 %v2096_v22, %v2096_v22  ;;  %v2130_v45 = vld [vmem:[%s2070_s23 + $0x30] sm:$0xff]  ;;  %v753_v46 = vmul.f32 %v2127_v44, %v2127_v44  ;;  %1802 = vrcp.f32 %v1908_v54 }
  0x39   : > { %s1622_s20 = sshll.u32 %s602_s13, 3  ;;  %v2079_v14 = vld [vmem:[%s2070_s23 + $0x40] sm:$0xff]  ;;  %v755_v18 = vmul.f32 %v2076_v13, %v2076_v13  ;;  %v2105_v27 = vld [vmem:[%s2070_s23 + $0x48] sm:$0xff]  ;;  %v756_v30 = vmul.f32 %v2099_v23, %v2099_v23  ;;  %v757_v47 = vmul.f32 %v2130_v45, %v2130_v45  ;;  %v2137_v48 = vld [vmem:[%s2070_s23 + $0x50] sm:$0xff]  ;;  %s2696_s27 = smov %s2695_s15 }
  0x3a   : > { %s2061_s24 = sadd.s32 %s1622_s20, %s604_s14  ;;  %v759_v19 = vmul.f32 %v2079_v14, %v2079_v14  ;;  %v763_v24 = vsel %vm639_vm0, %v751_v17, 0.0  ;;  %v760_v31 = vmul.f32 %v2105_v27, %v2105_v27  ;;  %v768_v35 = vsel %vm639_vm0, %v752_v29, 0.0  ;;  %v2146_v62 = vld [vmem:[%s2070_s23 + $0x18] sm:$0xff]  ;;  %v2171_v11 = vld [vmem:[%s2675_s9 + $0x8] sm:$0xff]  ;;  %s2711_s13 = sld [smem:[#allocation8_spill]] }
  0x3b   : > { %s1623_s26 = sshll.u32 %s2061_s24, 3  ;;  %v764_v25 = vsel %vm639_vm0, %v755_v18, 0.0  ;;  %v769_v36 = vsel %vm639_vm0, %v756_v30, 0.0  ;;  %v761_v49 = vmul.f32 %v2137_v48, %v2137_v48  ;;  %v773_v50 = vsel %vm639_vm0, %v753_v46, 0.0  ;;  %v2149_v63 = vld [vmem:[%s2070_s23 + $0x38] sm:$0xff]  ;;  %1003 = vmatpush.bf16.msra.mxu2 %v2171_v11  ;;  %s2570_s14 = scalar_lea.vmem [#allocation3], %s2059_s21 }
  0x3c   : > { %s608_s22 = scalar_lea.vmem %s2666_s0, %s1623_s26  ;;  %v766_v26 = vsel %vm639_vm0, %v759_v19, 0.0  ;;  %v765_v28 = vadd.f32 %v764_v25, %v763_v24  ;;  %v770_v37 = vadd.f32 %v769_v36, %v768_v35  ;;  %v771_v38 = vsel %vm639_vm0, %v760_v31, 0.0  ;;  %v2158_v3 = vld [vmem:[%s2070_s23 + $0x58] sm:$0xff]  ;;  %s1738_s24 = smul.u32 (%p2032_p6), 24, %s1894_s16 }
  0x3d   : > { %v2081_v15 = vld [vmem:[%s608_s22 + $0x10] sm:$0xff]  ;;  %v2083_v16 = vld [vmem:[%s608_s22] sm:$0xff]  ;;  %v2113_v32 = vld [vmem:[%s608_s22 + $0x18] sm:$0xff]  ;;  %v774_v51 = vsel %vm639_vm0, %v757_v47, 0.0  ;;  %v776_v53 = vsel %vm639_vm0, %v761_v49, 0.0  ;;  %v754_v1 = vmul.f32 %v2146_v62, %v2146_v62  ;;  %v758_v2 = vmul.f32 %v2149_v63, %v2149_v63 }
  0x3e   : > { %v646_v20 = vsel %vm639_vm0, %v2081_v15, 0.0  ;;  %v640_v21 = vsel %vm639_vm0, %v2083_v16, 0.0  ;;  %v2115_v33 = vld [vmem:[%s608_s22 + $0x8] sm:$0xff]  ;;  %v767_v34 = vadd.f32 %v766_v26, %v765_v28  ;;  %v649_v39 = vsel %vm639_vm0, %v2113_v32, 0.0  ;;  %v1803_v57 = vpop.eup %1802  ;;  %s2712_s22 = sld [smem:[#allocation9_spill]] }
  0x3f   : > { %647 = vadd.xlane.f32.xlu1 %v646_v20  ;;  %641 = vadd.xlane.f32.xlu0 %v640_v21  ;;  %v643_v40 = vsel %vm639_vm0, %v2115_v33, 0.0  ;;  %v772_v42 = vadd.f32 %v771_v38, %v770_v37  ;;  %v775_v52 = vadd.f32 %v774_v51, %v773_v50  ;;  %v653_v58 = vmul.f32 32.0, %v1803_v57  ;;  %v2180_v20 = vld [vmem:[%s2675_s9] sm:$0xff] }
  0x40   : > { %v783_v41 = vsel %vm639_vm0, %v767_v34, 0.0  ;;  %vm657_vm1 = vweird.f32 %v1803_v57  ;;  %v762_v7 = vmul.f32 %v2158_v3, %v2158_v3  ;;  %v778_v8 = vsel %vm639_vm0, %v754_v1, 0.0  ;;  %1004 = vmatpush.bf16.msra.mxu2 %v2180_v20 }
  0x41   : > { %784 = vadd.xlane.f32.xlu2 %v783_v41  ;;  %v786_v43 = vsel %vm639_vm0, %v772_v42, 0.0  ;;  %v777_v55 = vadd.f32 %v776_v53, %v775_v52  ;;  %v654_v59 = vsub.f32 1.0, %v653_v58  ;;  %v779_v9 = vsel %vm639_vm0, %v758_v2, 0.0 }
  0x42   : > { %v780_v18 = vadd.f32 %v779_v9, %v778_v8  ;;  %v781_v19 = vsel %vm639_vm0, %v762_v7, 0.0 }
  0x43   : > { %v789_v56 = vsel %vm639_vm0, %v777_v55, 0.0  ;;  %v655_v60 = vmul.f32 %v1803_v57, %v654_v59 }
  0x44   : > { %v782_v29 = vadd.f32 %v781_v19, %v780_v18  ;;  %v1716_v18 = vld [vmem:[%s2673_s7 + $0x8] sm:$0xff]  ;;  %s2579_s23 = scalar_lea.vmem %s2712_s22, %s1623_s26  ;;  %s1405_s26 = sadd.s32 (%p2032_p6), %s1738_s24, %s2052_s10 }
  0x45   : > { %v656_v61 = vadd.f32 %v1803_v57, %v655_v60  ;;  %950 = vmatpush.bf16.msra.mxu1 %v1716_v18  ;;  %s1710_s29 = sshll.u32 (%p2032_p6), %s1405_s26, 3 }
  0x46   : > { %v792_v36 = vsel %vm639_vm0, %v782_v29, 0.0 }
  0x47   : > { %650 = vadd.xlane.f32.xlu1 %v649_v39  ;;  %644 = vadd.xlane.f32.xlu0 %v643_v40  ;;  %v2151_v0 = vsel %vm657_vm1, %v1803_v57, %v656_v61 }
  0x49   : > { %787 = vadd.xlane.f32.xlu2 %v786_v43 }
  0x51   : > { %790 = vadd.xlane.f32.xlu2 %v789_v56 }
  0xb2   : > { %v648_v4 = vpop.xlane.xlu1 %647  ;;  %v642_v5 = vpop.xlane.xlu0 %641 }
  0xb3   : > { %v659_v6 = vmul.f32 %v2151_v0, %v642_v5  ;;  %v661_v25 = vmul.f32 %v2151_v0, %v648_v4  ;;  %v2219_v4 = vld [vmem:[%s2670_s4] ss:$0 sm:$0xff] }
  0xb5   : > { %v2166_v10 = vsub.f32 %v2083_v16, %v659_v6  ;;  %v2194_v34 = vsub.f32 %v2081_v15, %v661_v25  ;;  %v1715_v25 = vld [vmem:[%s2673_s7] sm:$0xff] }
  0xb6   : > { %951 = vmatpush.bf16.msra.mxu1 %v1715_v25 }
  0xb7   : > { %v667_v17 = vmul.f32 %v2166_v10, %v2166_v10 }
  0xb9   : > { %v671_v16 = vsel %vm639_vm0, %v667_v17, 0.0  ;;  %v1714_v17 = vld [vmem:[%s2671_s5 + $0x8] sm:$0xff] }
  0xba   : > { %v651_v21 = vpop.xlane.xlu1 %650  ;;  %672 = vadd.xlane.f32.xlu0 %v671_v16  ;;  %v645_v24 = vpop.xlane.xlu0 %644  ;;  %911 = vmatpush.bf16.msra.mxu0 %v1714_v17 }
  0xbb   : > { %v662_v26 = vmul.f32 %v2151_v0, %v651_v21  ;;  %v660_v28 = vmul.f32 %v2151_v0, %v645_v24  ;;  %1727 = vmatpush.bf16.msra.mxu3 %v1714_v17  ;;  %v1713_v24 = vld [vmem:[%s2671_s5] sm:$0xff] }
  0xbd   : > { %v2188_v30 = vsub.f32 %v2113_v32, %v662_v26  ;;  %v2191_v31 = vsub.f32 %v2115_v33, %v660_v28  ;;  %v669_v32 = vmul.f32 %v2194_v34, %v2194_v34  ;;  %v785_v33 = vpop.xlane.xlu2 %784 }
  0xbe   : > { %v795_v41 = vmul.f32 %v785_v33, %v2151_v0  ;;  %912 = vmatpush.bf16.msra.mxu0 %v1713_v24 }
  0xbf   : > { %v668_v35 = vmul.f32 %v2191_v31, %v2191_v31  ;;  %v670_v37 = vmul.f32 %v2188_v30, %v2188_v30  ;;  %v677_v15 = vsel %vm639_vm0, %v669_v32, 0.0  ;;  %1728 = vmatpush.bf16.msra.mxu3 %v1713_v24 }
  0xc0   : > { %v799_v43 = vadd.f32 1e-05, %v795_v41 }
  0xc1   : > { %v674_v38 = vsel %vm639_vm0, %v668_v35, 0.0  ;;  %v680_v39 = vsel %vm639_vm0, %v670_v37, 0.0 }
  0xc2   : > { %675 = vadd.xlane.f32.xlu1 %v674_v38  ;;  %793 = vadd.xlane.f32.xlu0 %v792_v36  ;;  %1804 = vrsqrt.f32 %v799_v43  ;;  %vm809_vm2 = vweird.f32 %v799_v43 }
  0xc3   : > { %681 = vadd.xlane.f32.xlu2 %v680_v39  ;;  %1729 = vmatpush.bf16.msrb.mxu3 %v2171_v11 }
  0xc5   : > { %v788_v40 = vpop.xlane.xlu2 %787 }
  0xc6   : > { %v796_v42 = vmul.f32 %v788_v40, %v2151_v0 }
  0xc7   : > { %1730 = vmatpush.bf16.msrb.mxu3 %v2180_v20 }
  0xc8   : > { %v800_v46 = vadd.f32 1e-05, %v796_v42  ;;  %v1805_v47 = vpop.eup %1804 }
  0xc9   : > { %v804_v50 = vmul.f32 %v1805_v47, %v799_v43  ;;  %vm810_vm3 = vweird.f32 %v1805_v47 }
  0xca   : > { %678 = vadd.xlane.f32.xlu1 %v677_v15  ;;  %1806 = vrsqrt.f32 %v800_v46  ;;  %vm819_vm4 = vweird.f32 %v800_v46  ;;  %vm811_vm6 = vmor %vm809_vm2, %vm810_vm3 }
  0xcb   : > { %v805_v52 = vmul.f32 %v1805_v47, %v804_v50 }
  0xcd   : > { %v806_v54 = vmul.f32 0.5, %v805_v52 }
  0xcf   : > { %v807_v56 = vsub.f32 1.5, %v806_v54 }
  0xd0   : > { %v1807_v49 = vpop.eup %1806 }
  0xd1   : > { %v814_v51 = vmul.f32 %v1807_v49, %v800_v46  ;;  %vm820_vm5 = vweird.f32 %v1807_v49  ;;  %v808_v58 = vmul.f32 %v1805_v47, %v807_v56 }
  0xd2   : > { %vm821_vm7 = vmor %vm819_vm4, %vm820_vm5 }
  0xd3   : > { %v815_v53 = vmul.f32 %v1807_v49, %v814_v51  ;;  %v2208_v60 = vsel %vm811_vm6, %v1805_v47, %v808_v58 }
  0xd4   : > { %v843_v1 = vmul.f32 %v2208_v60, %v2073_v12  ;;  %v791_v12 = vpop.xlane.xlu2 %790 }
  0xd5   : > { %v816_v55 = vmul.f32 0.5, %v815_v53  ;;  %v797_v8 = vmul.f32 %v791_v12, %v2151_v0 }
  0xd6   : > { %v2222_v5 = vmul.f32 %v2219_v4, %v843_v1 }
  0xd7   : > { %v817_v57 = vsub.f32 1.5, %v816_v55 }
  0xd9   : > { %v818_v59 = vmul.f32 %v1807_v49, %v817_v57 }
  0xdb   : > { %v2210_v61 = vsel %vm821_vm7, %v1807_v49, %v818_v59 }
  0xdc   : > { %v844_v2 = vmul.f32 %v2210_v61, %v2096_v22  ;;  %v801_v22 = vadd.f32 1e-05, %v797_v8 }
  0xde   : > { %v2225_v6 = vmul.f32 %v2219_v4, %v844_v2  ;;  %1808 = vrsqrt.f32 %v801_v22  ;;  %vm829_vm8 = vweird.f32 %v801_v22 }
  0xe0   : > { %v873_v7 = vpack.c.bf16 %v2225_v6, %v2222_v5 }
  0xe2   : > { %1655 = vmatmul.msk.bf16.vlgmr.msra.gmra.mxu2 %vm639_vm0, %v873_v7 }
  0xe4   : > { %v1809_v16 = vpop.eup %1808 }
  0xe5   : > { %v824_v26 = vmul.f32 %v1809_v16, %v801_v22  ;;  %vm830_vm9 = vweird.f32 %v1809_v16 }
  0xe6   : > { %vm831_vm12 = vmor %vm829_vm8, %vm830_vm9 }
  0xe7   : > { %v825_v35 = vmul.f32 %v1809_v16, %v824_v26 }
  0xe9   : > { %v826_v42 = vmul.f32 0.5, %v825_v35 }
  0xeb   : > { %v827_v47 = vsub.f32 1.5, %v826_v42 }
  0xed   : > { %v828_v56 = vmul.f32 %v1809_v16, %v827_v47 }
  0xef   : > { %v2250_v12 = vsel %vm831_vm12, %v1809_v16, %v828_v56 }
 0x12d   : > { %v673_v9 = vpop.xlane.xlu0 %672 }
 0x12e   : > { %v683_v19 = vmul.f32 %v673_v9, %v2151_v0 }
 0x130   : > { %v687_v21 = vadd.f32 1e-05, %v683_v19 }
 0x132   : > { %1810 = vrsqrt.f32 %v687_v21  ;;  %vm697_vm11 = vweird.f32 %v687_v21 }
 0x135   : > { %v676_v28 = vpop.xlane.xlu1 %675  ;;  %v794_v29 = vpop.xlane.xlu0 %793 }
 0x136   : > { %v684_v36 = vmul.f32 %v676_v28, %v2151_v0  ;;  %v798_v37 = vmul.f32 %v794_v29, %v2151_v0  ;;  %v682_v38 = vpop.xlane.xlu2 %681  ;;  %v1721_v28 = vld [vmem:[%s2696_s27 + $0x10] sm:$0xff] }
 0x137   : > { %v686_v39 = vmul.f32 %v682_v38, %v2151_v0 }
 0x138   : > { %v1811_v32 = vpop.eup %1810  ;;  %v688_v15 = vadd.f32 1e-05, %v684_v36  ;;  %v802_v33 = vadd.f32 1e-05, %v798_v37  ;;  %v845_v36 = vmul.f32 %v2250_v12, %v2127_v44 }
 0x139   : > { %v692_v40 = vmul.f32 %v1811_v32, %v687_v21  ;;  %v690_v41 = vadd.f32 1e-05, %v686_v39  ;;  %vm698_vm10 = vweird.f32 %v1811_v32  ;;  %v1797_v21 = vld [vmem:[%s2668_s2] ss:$0 sm:$0xff] }
 0x13a   : > { %1812 = vrsqrt.f32 %v688_v15  ;;  %vm699_vm13 = vmor %vm697_vm11, %vm698_vm10  ;;  %vm707_vm14 = vweird.f32 %v688_v15  ;;  %vm839_vm3 = vweird.f32 %v802_v33 }
 0x13b   : > { %v693_v43 = vmul.f32 %v1811_v32, %v692_v40  ;;  %1814 = vrsqrt.f32 %v802_v33  ;;  %vm727_vm1 = vweird.f32 %v690_v41 }
 0x13c   : > { %1816 = vrsqrt.f32 %v690_v41 }
 0x13d   : > { %v694_v11 = vmul.f32 0.5, %v693_v43  ;;  %v679_v46 = vpop.xlane.xlu1 %678  ;;  %v2270_v43 = vmul.f32 %v2219_v4, %v845_v36 }
 0x13e   : > { %v685_v49 = vmul.f32 %v679_v46, %v2151_v0 }
 0x13f   : > { %v695_v50 = vsub.f32 1.5, %v694_v11 }
 0x140   : > { %v1813_v51 = vpop.eup %1812  ;;  %v689_v52 = vadd.f32 1e-05, %v685_v49 }
 0x141   : > { %v1815_v53 = vpop.eup %1814  ;;  %v696_v54 = vmul.f32 %v1811_v32, %v695_v50  ;;  %v702_v55 = vmul.f32 %v1813_v51, %v688_v15  ;;  %vm708_vm15 = vweird.f32 %v1813_v51 }
 0x142   : > { %v1817_v20 = vpop.eup %1816  ;;  %v834_v57 = vmul.f32 %v1815_v53, %v802_v33  ;;  %1818 = vrsqrt.f32 %v689_v52  ;;  %vm840_vm4 = vweird.f32 %v1815_v53  ;;  %vm709_vm5 = vmor %vm707_vm14, %vm708_vm15  ;;  %vm717_vm9 = vweird.f32 %v689_v52 }
 0x143   : > { %v703_v58 = vmul.f32 %v1813_v51, %v702_v55  ;;  %v722_v59 = vmul.f32 %v1817_v20, %v690_v41  ;;  %v700_v0 = vsel %vm699_vm13, %v1811_v32, %v696_v54  ;;  %vm728_vm2 = vweird.f32 %v1817_v20  ;;  %vm841_vm7 = vmor %vm839_vm3, %vm840_vm4  ;;  %v1798_v32 = vld [vmem:[%s2669_s3] ss:$0 sm:$0xff] }
 0x144   : > { %v835_v1 = vmul.f32 %v1815_v53, %v834_v57  ;;  %v731_v18 = vmul.f32 %v700_v0, %v2166_v10  ;;  %vm2256_vm6 = vmor %vm727_vm1, %vm728_vm2  ;;  %v847_v55 = vmul.f32 %v2208_v60, %v2076_v13  ;;  %v853_v13 = vmul.f32 %v2250_v12, %v2137_v48 }
 0x145   : > { %v704_v2 = vmul.f32 0.5, %v703_v58  ;;  %v723_v7 = vmul.f32 %v1817_v20, %v722_v59 }
 0x146   : > { %v836_v8 = vmul.f32 0.5, %v835_v1  ;;  %v739_v39 = vmul.f32 %v1797_v21, %v731_v18  ;;  %v2316_v1 = vmul.f32 %v2219_v4, %v853_v13 }
 0x147   : > { %v705_v22 = vsub.f32 1.5, %v704_v2  ;;  %v724_v9 = vmul.f32 0.5, %v723_v7 }
 0x148   : > { %v1819_v17 = vpop.eup %1818  ;;  %v837_v19 = vsub.f32 1.5, %v836_v8  ;;  %v2276_v11 = vadd.f32 %v1798_v32, %v739_v39 }
 0x149   : > { %v706_v24 = vmul.f32 %v1813_v51, %v705_v22  ;;  %v725_v16 = vsub.f32 1.5, %v724_v9  ;;  %v712_v25 = vmul.f32 %v1819_v17, %v689_v52  ;;  %vm718_vm8 = vweird.f32 %v1819_v17 }
 0x14a   : > { %v838_v26 = vmul.f32 %v1815_v53, %v837_v19  ;;  %vm719_vm10 = vmor %vm717_vm9, %vm718_vm8  ;;  %v852_v22 = vmul.f32 %v2210_v61, %v2105_v27  ;;  %v2358_v27 = vld [vmem:[%s2674_s8] ss:$0 sm:$0xff]  ;;  %vm1242_vm9 = vcmask 523264  }
 0x14b   : > { %v710_v29 = vsel %vm709_vm5, %v1813_v51, %v706_v24  ;;  %v726_v35 = vmul.f32 %v1817_v20, %v725_v16  ;;  %v713_v10 = vmul.f32 %v1819_v17, %v712_v25  ;;  %v1722_v25 = vld [vmem:[%s2695_s15 + $0x18] sm:$0xff] }
 0x14c   : > { %v732_v37 = vmul.f32 %v710_v29, %v2191_v31  ;;  %v842_v38 = vsel %vm841_vm7, %v1815_v53, %v838_v26  ;;  %v1725_v29 = vld [vmem:[%s2678_s12 + $0x10] sm:$0xff] }
 0x14d   : > { %v730_v15 = vsel %vm2256_vm6, %v1817_v20, %v726_v35  ;;  %v714_v33 = vmul.f32 0.5, %v713_v10  ;;  %v846_v40 = vmul.f32 %v842_v38, %v2146_v62  ;;  %v848_v20 = vmul.f32 %v2210_v61, %v2099_v23 }
 0x14e   : > { %v740_v41 = vmul.f32 %v1797_v21, %v732_v37  ;;  %v734_v31 = vmul.f32 %v730_v15, %v2188_v30  ;;  %v854_v59 = vmul.f32 %v842_v38, %v2158_v3  ;;  %v850_v0 = vmul.f32 %v842_v38, %v2149_v63  ;;  %v1724_v15 = vld [vmem:[%s2678_s12 + $0x8] sm:$0xff] }
 0x14f   : > { %v715_v42 = vsub.f32 1.5, %v714_v33  ;;  %v2273_v44 = vmul.f32 %v2219_v4, %v846_v40  ;;  %v2303_v57 = vmul.f32 %v2219_v4, %v848_v20  ;;  %v849_v3 = vmul.f32 %v2250_v12, %v2130_v45 }
 0x150   : > { %v2278_v46 = vadd.f32 %v1798_v32, %v740_v41  ;;  %v742_v30 = vmul.f32 %v1797_v21, %v734_v31  ;;  %v2313_v23 = vmul.f32 %v2219_v4, %v854_v59  ;;  %v2325_v48 = vmul.f32 %v2219_v4, %v850_v0 }
 0x151   : > { %v716_v47 = vmul.f32 %v1819_v17, %v715_v42  ;;  %v874_v62 = vpack.c.bf16 %v2273_v44, %v2270_v43  ;;  %v2328_v7 = vmul.f32 %v2219_v4, %v849_v3  ;;  %v851_v63 = vmul.f32 %v2208_v60, %v2079_v14  ;;  %v2353_v14 = vld [vmem:[%s2672_s6] ss:$0 sm:$0xff] }
 0x152   : > { %v871_v49 = vpack.c.bf16 %v2278_v46, %v2276_v11  ;;  %v2290_v52 = vadd.f32 %v1798_v32, %v742_v30  ;;  %v878_v2 = vpack.c.bf16 %v2313_v23, %v2316_v1  ;;  %v2341_v12 = vmul.f32 %v2219_v4, %v852_v22 }
 0x153   : > { %v720_v50 = vsel %vm719_vm10, %v1819_v17, %v716_v47  ;;  %1656 = vmatmul.msk.bf16.gmra.mxu2 %vm639_vm0, %v874_v62  ;;  %v876_v8 = vpack.c.bf16 %v2325_v48, %v2328_v7  ;;  %v2338_v45 = vmul.f32 %v2219_v4, %v851_v63 }
 0x154   : > { %v733_v51 = vmul.f32 %v720_v50, %v2194_v34  ;;  %1635 = vmatmul.msk.bf16.vlgmr.msra.gmra.mxu0 %vm639_vm0, %v871_v49  ;;  %1645 = vmatmul.msk.bf16.vlgmr.msra.gmra.mxu1 %vm639_vm0, %v871_v49  ;;  %v2300_v34 = vmul.f32 %v2219_v4, %v847_v55  ;;  %v1726_v4 = vld [vmem:[%s2678_s12 + $0x18] sm:$0xff]  ;;  %v1719_v50 = vld [vmem:[%s2696_s27] sm:$0xff] }
 0x155   : > { %v877_v9 = vpack.c.bf16 %v2341_v12, %v2338_v45  ;;  %1731 = vmatpush.bf16.msrb.mxu1 %v1726_v4  ;;  %1332 = vmatpush.bf16.msrb.mxu0 %v1726_v4 }
 0x156   : > { %v741_v53 = vmul.f32 %v1797_v21, %v733_v51  ;;  %v875_v58 = vpack.c.bf16 %v2303_v57, %v2300_v34  ;;  %v1723_v51 = vld [vmem:[%s2678_s12] sm:$0xff] }
 0x158   : > { %v2288_v54 = vadd.f32 %v1798_v32, %v741_v53  ;;  %v1720_v32 = vld [vmem:[%s2696_s27 + $0x8] sm:$0xff] }
 0x159   : > { %1333 = vmatpush.bf16.msrb.mxu0 %v1725_v29  ;;  %1732 = vmatpush.bf16.msrb.mxu1 %v1725_v29 }
 0x15a   : > { %v872_v56 = vpack.c.bf16 %v2290_v52, %v2288_v54 }
 0x15c   : > { %1636 = vmatmul.msk.bf16.vlgmr.msra.gmra.mxu3 %vm639_vm0, %v872_v56 }
 0x15d   : > { %1253 = vmatpush.bf16.msra.mxu3 %v1722_v25  ;;  %1334 = vmatpush.bf16.msrb.mxu0 %v1724_v15 }
 0x15e   : > { %1733 = vmatpush.bf16.msrb.mxu1 %v1724_v15 }
 0x161   : > { %1254 = vmatpush.bf16.msra.mxu3 %v1721_v28  ;;  %1335 = vmatpush.bf16.msrb.mxu0 %v1723_v51 }
 0x162   : > { %1734 = vmatpush.bf16.msrb.mxu1 %v1723_v51 }
 0x163   : > { %1657 = vmatmul.msk.bf16.gmra.mxu2 %vm639_vm0, %v875_v58 }
 0x164   : > { %1646 = vmatmul.msk.bf16.gmra.mxu1 %vm639_vm0, %v872_v56 }
 0x165   : > { %v2346_v17 = vpop.f32.mrf.mxu2  ;;  %1255 = vmatpush.bf16.msra.mxu3 %v1720_v32 }
 0x169   : > { %1256 = vmatpush.bf16.msra.mxu3 %v1719_v50 }
 0x16c   : > { %1660 = vmatmul.msk.bf16.vlgmr.msrb.gmra.mxu3 %vm639_vm0, %v878_v2 }
 0x16d   : > { %v2348_v18 = vpop.f32.mrf.mxu2 }
 0x173   : > { %1658 = vmatmul.msk.bf16.gmra.mxu2 %vm639_vm0, %v876_v8 }
 0x183   : > { %1659 = vmatmul.msk.bf16.gmra.mxu2 %vm639_vm0, %v877_v9 }
 0x1d1   : > { %v914_v60 = vpop.f32.mrf.mxu0  ;;  %v953_v61 = vpop.f32.mrf.mxu1 }
 0x1d2   : > { %v2364_v19 = vadd.f32 %v2353_v14, %v914_v60  ;;  %v954_v21 = vadd.f32 %v2358_v27, %v953_v61 }
 0x1d4   : > { %v1661_v24 = vmul.f32 -1.442695, %v2364_v19  ;;  %v1665_v16 = vmul.f32 -1.442695, %v954_v21 }
 0x1d6   : > { %1820 = vpow2.f32 %v1661_v24  ;;  %v2371_v26 = vpop.f32.mrf.mxu2 }
 0x1d7   : > { %1822 = vpow2.f32 %v1665_v16 }
 0x1d9   : > { %v916_v35 = vpop.f32.mrf.mxu0  ;;  %v955_v10 = vpop.f32.mrf.mxu1 }
 0x1da   : > { %v2380_v36 = vadd.f32 %v2353_v14, %v916_v35  ;;  %v956_v37 = vadd.f32 %v2358_v27, %v955_v10 }
 0x1dc   : > { %v1821_v38 = vpop.eup %1820  ;;  %v1662_v39 = vmul.f32 -1.442695, %v2380_v36  ;;  %v1666_v41 = vmul.f32 -1.442695, %v956_v37 }
 0x1dd   : > { %v1823_v33 = vpop.eup %1822  ;;  %v2390_v40 = vadd.f32 1.0, %v1821_v38 }
 0x1de   : > { %v2392_v42 = vadd.f32 1.0, %v1823_v33  ;;  %1824 = vpow2.f32 %v1662_v39  ;;  %v2394_v31 = vpop.f32.mrf.mxu2 }
 0x1df   : > { %1826 = vrcp.f32 %v2390_v40  ;;  %v919_v47 = vpop.f32.mrf.mxu3  ;;  %v1061_v16 = vand.u32 2147483647, %v2390_v40  ;;  %v1063_v25 = vand.u32 2147483648, %v2390_v40  ;;  %vm1057_vm11 = vweird.f32 %v2390_v40 }
 0x1e0   : > { %1828 = vrcp.f32 %v2392_v42  ;;  %v2399_v62 = vadd.f32 %v2353_v14, %v919_v47  ;;  %vm1137_vm13 = vweird.f32 %v2392_v42  ;;  %v1141_v33 = vand.u32 2147483647, %v2392_v42 }
 0x1e1   : > { %1830 = vpow2.f32 %v1666_v41  ;;  %v958_v49 = vpop.f32.mrf.mxu1  ;;  %vm2438_vm14 = vcmp.eq.f32.partialorder %v1061_v16, 8.507059e+37  ;;  %v1064_v15 = vor.u32 1.1754944e-38, %v1063_v25  ;;  %v1143_v41 = vand.u32 2147483648, %v2392_v42 }
 0x1e2   : > { %v1663_v30 = vmul.f32 -1.442695, %v2399_v62  ;;  %v959_v53 = vadd.f32 %v2358_v27, %v958_v49  ;;  %vm2464_vm4 = vcmp.eq.f32.partialorder %v1141_v33, 8.507059e+37 }
 0x1e4   : > { %v1825_v55 = vpop.eup %1824  ;;  %1832 = vpow2.f32 %v1663_v30  ;;  %v1667_v20 = vmul.f32 -1.442695, %v959_v53 }
 0x1e5   : > { %v1827_v56 = vpop.eup %1826  ;;  %v2409_v58 = vadd.f32 1.0, %v1825_v55 }
 0x1e6   : > { %v2411_v59 = vpop.eup %1828  ;;  %v1053_v13 = vmul.f32 %v1827_v56, %v2390_v40  ;;  %1834 = vpow2.f32 %v1667_v20  ;;  %v2414_v0 = vpop.f32.mrf.mxu2  ;;  %vm1058_vm12 = vweird.f32 %v1827_v56 }
 0x1e7   : > { %v1831_v2 = vpop.eup %1830  ;;  %1836 = vrcp.f32 %v2409_v58  ;;  %v921_v3 = vpop.f32.mrf.mxu3  ;;  %v1133_v22 = vmul.f32 %v2411_v59, %v2392_v42  ;;  %vm2449_vm15 = vmor %vm1057_vm11, %vm1058_vm12  ;;  %v1078_v30 = vand.u32 2147483648, %v2409_v58  ;;  %vm1138_vm1 = vweird.f32 %v2411_v59 }
 0x1e8   : > { %v1054_v8 = vsub.f32 1.0, %v1053_v13  ;;  %v2417_v63 = vadd.f32 1.0, %v1831_v2  ;;  %v2422_v9 = vadd.f32 %v2353_v14, %v921_v3  ;;  %v1076_v13 = vand.u32 2147483647, %v2409_v58  ;;  %vm2474_vm5 = vmor %vm1137_vm13, %vm1138_vm1 }
 0x1e9   : > { %v960_v60 = vpop.f32.mrf.mxu1  ;;  %v1134_v21 = vsub.f32 1.0, %v1133_v22  ;;  %vm1072_vm3 = vweird.f32 %v2409_v58 }
 0x1ea   : > { %v1833_v61 = vpop.eup %1832  ;;  %v1055_v4 = vmul.f32 %v1827_v56, %v1054_v8  ;;  %1838 = vrcp.f32 %v2417_v63  ;;  %v961_v24 = vadd.f32 %v2358_v27, %v960_v60  ;;  %v1664_v37 = vmul.f32 -1.442695, %v2422_v9 }
 0x1eb   : > { %v2428_v28 = vadd.f32 1.0, %v1833_v61  ;;  %v1135_v10 = vmul.f32 %v2411_v59, %v1134_v21  ;;  %v1144_v8 = vor.u32 1.1754944e-38, %v1143_v41  ;;  %v1079_v61 = vor.u32 1.1754944e-38, %v1078_v30 }
 0x1ec   : > { %v1835_v29 = vpop.eup %1834  ;;  %v1056_v35 = vadd.f32 %v1827_v56, %v1055_v4  ;;  %v1668_v39 = vmul.f32 -1.442695, %v961_v24  ;;  %vm1077_vm8 = vcmp.eq.f32.partialorder %v1076_v13, 8.507059e+37  ;;  %v1156_v42 = vand.u32 2147483647, %v2417_v63 }
 0x1ed   : > { %v1837_v14 = vpop.eup %1836  ;;  %1840 = vrcp.f32 %v2428_v28  ;;  %v2435_v38 = vadd.f32 1.0, %v1835_v29  ;;  %v1136_v55 = vadd.f32 %v2411_v59, %v1135_v10  ;;  %vm1152_vm10 = vweird.f32 %v2417_v63 }
 0x1ee   : > { %v1068_v27 = vmul.f32 %v1837_v14, %v2409_v58  ;;  %v2444_v47 = vpop.f32.mrf.mxu2  ;;  %v1060_v53 = vsel %vm2449_vm15, %v1827_v56, %v1056_v35  ;;  %vm1073_vm2 = vweird.f32 %v1837_v14  ;;  %v1158_v58 = vand.u32 2147483648, %v2417_v63 }
 0x1ef   : > { %1842 = vrcp.f32 %v2435_v38  ;;  %v1065_v22 = vsel %vm2438_vm14, %v1064_v15, %v1060_v53  ;;  %vm1074_vm6 = vmor %vm1072_vm3, %vm1073_vm2  ;;  %v1140_v24 = vsel %vm2474_vm5, %v2411_v59, %v1136_v55  ;;  %vm1157_vm12 = vcmp.eq.f32.partialorder %v1156_v42, 8.507059e+37 }
 0x1f0   : > { %v1839_v49 = vpop.eup %1838  ;;  %v1069_v51 = vsub.f32 1.0, %v1068_v27  ;;  %1844 = vpow2.f32 %v1664_v37  ;;  %v1112_v59 = vmul.f32 %v1065_v22, %v2364_v19  ;;  %v1093_v3 = vand.u32 2147483648, %v2428_v28 }
 0x1f1   : > { %v1148_v20 = vmul.f32 %v1839_v49, %v2417_v63  ;;  %1846 = vpow2.f32 %v1668_v39  ;;  %vm1153_vm7 = vweird.f32 %v1839_v49  ;;  %v1159_v63 = vor.u32 1.1754944e-38, %v1158_v58 }
 0x1f2   : > { %v1070_v40 = vmul.f32 %v1837_v14, %v1069_v51  ;;  %vm1154_vm11 = vmor %vm1152_vm10, %vm1153_vm7  ;;  %vm1087_vm13 = vweird.f32 %v2428_v28  ;;  %v1094_v4 = vor.u32 1.1754944e-38, %v1093_v3  ;;  %vm1167_vm3 = vweird.f32 %v2435_v38 }
 0x1f3   : > { %v2461_v2 = vpop.eup %1840  ;;  %v1149_v56 = vsub.f32 1.0, %v1148_v20  ;;  %v1091_v20 = vand.u32 2147483647, %v2428_v28 }
 0x1f4   : > { %v1071_v60 = vadd.f32 %v1837_v14, %v1070_v40  ;;  %v1083_v21 = vmul.f32 %v2461_v2, %v2428_v28  ;;  %vm1088_vm14 = vweird.f32 %v2461_v2 }
 0x1f5   : > { %v1150_v16 = vmul.f32 %v1839_v49, %v1149_v56  ;;  %v2484_v25 = vpop.eup %1842  ;;  %vm2517_vm15 = vcmp.eq.f32.partialorder %v1091_v20, 8.507059e+37  ;;  %vm2526_vm2 = vmor %vm1087_vm13, %vm1088_vm14 }
 0x1f6   : > { %v1075_v29 = vsel %vm1074_vm6, %v1837_v14, %v1071_v60  ;;  %v1845_v35 = vpop.eup %1844  ;;  %v1163_v27 = vmul.f32 %v2484_v25, %v2435_v38  ;;  %v2494_v14 = vsel %vm2464_vm4, %v1144_v8, %v1140_v24  ;;  %v1084_v33 = vsub.f32 1.0, %v1083_v21  ;;  %v2499_v51 = vpop.f32.mrf.mxu2 }
 0x1f7   : > { %v1080_v10 = vsel %vm1077_vm8, %v1079_v61, %v1075_v29  ;;  %v1151_v37 = vadd.f32 %v1839_v49, %v1150_v16  ;;  %v1847_v39 = vpop.eup %1846  ;;  %v1051_v15 = vadd.f32 1.0, %v1845_v35  ;;  %v1192_v53 = vmul.f32 %v2494_v14, %v2346_v17 }
 0x1f8   : > { %v1113_v32 = vmul.f32 %v1080_v10, %v2380_v36  ;;  %v2497_v41 = vadd.f32 1.0, %v1847_v39  ;;  %v1164_v19 = vsub.f32 1.0, %v1163_v27  ;;  %vm1168_vm1 = vweird.f32 %v2484_v25 }
 0x1f9   : > { %v1155_v50 = vsel %vm1154_vm11, %v1839_v49, %v1151_v37  ;;  %1848 = vrcp.f32 %v1051_v15  ;;  %v1085_v49 = vmul.f32 %v2461_v2, %v1084_v33  ;;  %v1171_v21 = vand.u32 2147483647, %v2435_v38  ;;  %vm2536_vm5 = vmor %vm1167_vm3, %vm1168_vm1 }
 0x1fa   : > { %v1204_v30 = vpack.c.bf16 %v1113_v32, %v1112_v59  ;;  %1850 = vrcp.f32 %v2497_v41  ;;  %v2502_v36 = vsel %vm1157_vm12, %v1159_v63, %v1155_v50  ;;  %v1165_v13 = vmul.f32 %v2484_v25, %v1164_v19 }
 0x1fb   : > { %v1193_v55 = vmul.f32 %v2502_v36, %v2348_v18  ;;  %v1086_v17 = vadd.f32 %v2461_v2, %v1085_v49  ;;  %v1173_v24 = vand.u32 2147483648, %v2435_v38  ;;  %v1106_v29 = vand.u32 2147483647, %v1051_v15 }
 0x1fc   : > { %1685 = vmatmul.msk.bf16.vlgmr.msra.gmra.mxu3 %vm1242_vm9, %v1204_v30  ;;  %v1166_v60 = vadd.f32 %v2484_v25, %v1165_v13  ;;  %v1108_v42 = vand.u32 2147483648, %v1051_v15  ;;  %v1188_v39 = vand.u32 2147483648, %v2497_v41  ;;  %v1186_v32 = vand.u32 2147483647, %v2497_v41 }
 0x1fd   : > { %v1268_v40 = vpack.c.bf16 %v1193_v55, %v1192_v53  ;;  %v1090_v10 = vsel %vm2526_vm2, %v2461_v2, %v1086_v17  ;;  %vm1102_vm7 = vweird.f32 %v1051_v15  ;;  %vm1172_vm8 = vcmp.eq.f32.partialorder %v1171_v21, 8.507059e+37 }
 0x1fe   : > { %v1023_v28 = vpop.f32.mrf.mxu2  ;;  %v1170_v59 = vsel %vm2536_vm5, %v2484_v25, %v1166_v60  ;;  %v1174_v2 = vor.u32 1.1754944e-38, %v1173_v24  ;;  %v1095_v50 = vsel %vm2517_vm15, %v1094_v4, %v1090_v10  ;;  %v1109_v63 = vor.u32 1.1754944e-38, %v1108_v42  ;;  %v1031_v4 = vpop.f32.mrf.mxu3 }
 0x1ff   : > { %v1849_v8 = vpop.eup %1848  ;;  %1703 = vmatmul.msk.bf16.vlgmr.msrb.gmra.mxu0 %vm1242_vm9, %v1268_v40  ;;  %vm1182_vm11 = vweird.f32 %v2497_v41  ;;  %vm1107_vm12 = vcmp.eq.f32.partialorder %v1106_v29, 8.507059e+37  ;;  %v1189_v25 = vor.u32 1.1754944e-38, %v1188_v39  ;;  %vm1187_vm14 = vcmp.eq.f32.partialorder %v1186_v32, 8.507059e+37 }
 0x200   : > { %v1851_v56 = vpop.eup %1850  ;;  %v1098_v18 = vmul.f32 %v1849_v8, %v1051_v15  ;;  %vm1103_vm4 = vweird.f32 %v1849_v8  ;;  %v1175_v53 = vsel %vm1172_vm8, %v1174_v2, %v1170_v59  ;;  %v1114_v15 = vmul.f32 %v1095_v50, %v2399_v62 }
 0x201   : > { %v1178_v61 = vmul.f32 %v1851_v56, %v2497_v41  ;;  %vm1183_vm6 = vweird.f32 %v1851_v56  ;;  %vm1104_vm10 = vmor %vm1102_vm7, %vm1103_vm4  ;;  %v1194_v13 = vmul.f32 %v1175_v53, %v2371_v26  ;;  %v1198_v3 = vmul.f32 %v1175_v53, %v2499_v51 }
 0x202   : > { %v1099_v58 = vsub.f32 1.0, %v1098_v18  ;;  %vm1184_vm13 = vmor %vm1182_vm11, %vm1183_vm6  ;;  %v1202_v24 = vmul.f32 %v1175_v53, %v1031_v4 }
 0x203   : > { %v1179_v35 = vsub.f32 1.0, %v1178_v61 }
 0x204   : > { %v1100_v37 = vmul.f32 %v1849_v8, %v1099_v58 }
 0x205   : > { %v1180_v38 = vmul.f32 %v1851_v56, %v1179_v35 }
 0x206   : > { %v1101_v33 = vadd.f32 %v1849_v8, %v1100_v37  ;;  %v1033_v58 = vpop.f32.mrf.mxu3 }
 0x207   : > { %v1181_v30 = vadd.f32 %v1851_v56, %v1180_v38 }
 0x208   : > { %v1105_v19 = vsel %vm1104_vm10, %v1849_v8, %v1101_v33  ;;  %v1026_v8 = vpop.f32.mrf.mxu2 }
 0x209   : > { %v1110_v55 = vsel %vm1107_vm12, %v1109_v63, %v1105_v19  ;;  %v1185_v49 = vsel %vm1184_vm13, %v1851_v56, %v1181_v30  ;;  %v1200_v51 = vmul.f32 %v2494_v14, %v1026_v8 }
 0x20a   : > { %v1115_v20 = vmul.f32 %v1110_v55, %v2422_v9  ;;  %v1190_v40 = vsel %vm1187_vm14, %v1189_v25, %v1185_v49  ;;  %v1197_v9 = vmul.f32 %v2502_v36, %v2444_v47 }
 0x20b   : > { %v1195_v17 = vmul.f32 %v1190_v40, %v2394_v31  ;;  %v1199_v41 = vmul.f32 %v1190_v40, %v1023_v28  ;;  %v1196_v31 = vmul.f32 %v2494_v14, %v2414_v0  ;;  %v1203_v21 = vmul.f32 %v1190_v40, %v1033_v58  ;;  %v1801_v0 = vld [vmem:[%s2711_s13] ss:$0 sm:$0xff]  ;;  %s2714_s13 = sld [smem:[#allocation10_spill]] (%p2032_p6) }
 0x20c   : > { %v1205_v18 = vpack.c.bf16 %v1115_v20, %v1114_v15 }
 0x20d   : > { %v1271_v22 = vpack.c.bf16 %v1199_v41, %v1198_v3  ;;  %v1269_v60 = vpack.c.bf16 %v1195_v17, %v1194_v13  ;;  %v1270_v56 = vpack.c.bf16 %v1197_v9, %v1196_v31  ;;  %v1273_v47 = vpack.c.bf16 %v1203_v21, %v1202_v24 }
 0x20e   : > { %1686 = vmatmul.msk.bf16.gmra.mxu3 %vm1242_vm9, %v1205_v18 }
 0x20f   : > { %1704 = vmatmul.msk.bf16.gmra.mxu0 %vm1242_vm9, %v1269_v60  ;;  %1706 = vmatmul.msk.bf16.vlgmr.msrb.gmra.mxu1 %vm1242_vm9, %v1271_v22 }
 0x210   : > { %v1028_v62 = vpop.f32.mrf.mxu2 }
 0x211   : > { %v1201_v26 = vmul.f32 %v2502_v36, %v1028_v62  ;;  %s1407_s20 = scalar_lea.vmem (%p2032_p6), %s2714_s13, %s1710_s29 }
 0x213   : > { %v1272_v61 = vpack.c.bf16 %v1201_v26, %v1200_v51 }
 0x21f   : > { %1705 = vmatmul.msk.bf16.gmra.mxu0 %vm1242_vm9, %v1270_v56  ;;  %1707 = vmatmul.msk.bf16.gmra.mxu1 %vm1242_vm9, %v1272_v61 }
 0x22f   : > { %1708 = vmatmul.msk.bf16.gmra.mxu1 %vm1242_vm9, %v1273_v47 }
 0x27c   : > { %v1337_v36 = vpop.f32.mrf.mxu0 }
 0x27d   : > { %v1338_v14 = vadd.f32 %v1337_v36, %v2222_v5 }
 0x27f   : > { %v1258_v28 = vpop.f32.mrf.mxu3  ;;  %1371 = vst.msk [vmem:[%s2570_s14] sm:$0xff] %vm639_vm0, %v1338_v14 }
 0x280   : > { %v1259_v16 = vadd.f32 %v1801_v0, %v1258_v28 }
 0x282   : > { %v1282_v5 = vadd.f32 %v1259_v16, %v2276_v11 }
 0x284   : > { %1367 = vst.msk [vmem:[%s2579_s23] sm:$0xff] %vm639_vm0, %v1282_v5  ;;  %v1339_v29 = vpop.f32.mrf.mxu0 }
 0x285   : > { %v1340_v42 = vadd.f32 %v1339_v29, %v2225_v6 }
 0x287   : > { %v1260_v35 = vpop.f32.mrf.mxu3  ;;  %1372 = vst.msk [vmem:[%s2570_s14 + $0x8] sm:$0xff] %vm639_vm0, %v1340_v42 }
 0x288   : > { %v1261_v10 = vadd.f32 %v1801_v0, %v1260_v35 }
 0x28a   : > { %v1283_v37 = vadd.f32 %v1261_v10, %v2278_v46 }
 0x28c   : > { %1368 = vst.msk [vmem:[%s2579_s23 + $0x8] sm:$0xff] %vm639_vm0, %v1283_v37  ;;  %v1342_v27 = vpop.f32.mrf.mxu0  ;;  %v1352_v39 = vpop.f32.mrf.mxu1 }
 0x28d   : > { %v1343_v11 = vadd.f32 %v1342_v27, %v2270_v43  ;;  %v1353_v59 = vadd.f32 %v1352_v39, %v2328_v7 }
 0x28f   : > { %1373 = vst.msk [vmem:[%s2570_s14 + $0x10] sm:$0xff] %vm639_vm0, %v1343_v11 }
 0x290   : > { %1377 = vst.msk [vmem:[%s2570_s14 + $0x30] sm:$0xff] %vm639_vm0, %v1353_v59 }
 0x291   : > { %v1263_v6 = vpop.f32.mrf.mxu3 }
 0x292   : > { %v1264_v38 = vadd.f32 %v1801_v0, %v1263_v6 }
 0x294   : > { %v1284_v32 = vadd.f32 %v1264_v38, %v2288_v54  ;;  %v1344_v46 = vpop.f32.mrf.mxu0  ;;  %v1354_v33 = vpop.f32.mrf.mxu1 }
 0x295   : > { %v1345_v2 = vadd.f32 %v1344_v46, %v2273_v44  ;;  %v1355_v50 = vadd.f32 %v1354_v33, %v2325_v48 }
 0x296   : > { %1369 = vst.msk [vmem:[%s2579_s23 + $0x10] sm:$0xff] %vm639_vm0, %v1284_v32 }
 0x297   : > { %1374 = vst.msk [vmem:[%s2570_s14 + $0x18] sm:$0xff] %vm639_vm0, %v1345_v2  ;;  %v1470_v40 = vld [vmem:[%s2570_s14 + $0x30] sm:$0xff] (%p2032_p6) }
 0x298   : > { %1378 = vst.msk [vmem:[%s2570_s14 + $0x38] sm:$0xff] %vm639_vm0, %v1355_v50 }
 0x299   : > { %v1265_v43 = vpop.f32.mrf.mxu3  ;;  %1471 = vst [vmem:[%s1407_s20 + $0x50] sm:$0xff] (%p2032_p6), %v1470_v40 }
 0x29a   : > { %v1266_v7 = vadd.f32 %v1801_v0, %v1265_v43 }
 0x29c   : > { %v1285_v54 = vadd.f32 %v1266_v7, %v2290_v52  ;;  %v1347_v63 = vpop.f32.mrf.mxu0  ;;  %v1357_v30 = vpop.f32.mrf.mxu1 }
 0x29d   : > { %v1348_v19 = vadd.f32 %v1347_v63, %v2300_v34  ;;  %v1358_v44 = vadd.f32 %v1357_v30, %v2338_v45 }
 0x29e   : > { %1370 = vst.msk [vmem:[%s2579_s23 + $0x18] sm:$0xff] %vm639_vm0, %v1285_v54 }
 0x29f   : > { %1375 = vst.msk [vmem:[%s2570_s14 + $0x20] sm:$0xff] %vm639_vm0, %v1348_v19  ;;  %v1472_v13 = vld [vmem:[%s2570_s14 + $0x38] sm:$0xff] (%p2032_p6) }
 0x2a0   : > { %1379 = vst.msk [vmem:[%s2570_s14 + $0x40] sm:$0xff] %vm639_vm0, %v1358_v44 }
 0x2a1   : > { %1473 = vst [vmem:[%s1407_s20 + $0x58] sm:$0xff] (%p2032_p6), %v1472_v13 }
 0x2a4   : > { %v1349_v48 = vpop.f32.mrf.mxu0  ;;  %v1359_v53 = vpop.f32.mrf.mxu1 }
 0x2a5   : > { %v1350_v25 = vadd.f32 %v1349_v48, %v2303_v57  ;;  %v1360_v52 = vadd.f32 %v1359_v53, %v2341_v12  ;;  %v1458_v57 = vld [vmem:[%s2570_s14] sm:$0xff] (%p2032_p6)  ;;  %v1464_v12 = vld [vmem:[%s2570_s14 + $0x18] sm:$0xff] (%p2032_p6) }
 0x2a6   : > { %1459 = vst [vmem:[%s1407_s20] sm:$0xff] (%p2032_p6), %v1458_v57  ;;  %v1466_v15 = vld [vmem:[%s2570_s14 + $0x20] sm:$0xff] (%p2032_p6) }
 0x2a7   : > { %1376 = vst.msk [vmem:[%s2570_s14 + $0x28] sm:$0xff] %vm639_vm0, %v1350_v25  ;;  %v1474_v3 = vld [vmem:[%s2570_s14 + $0x40] sm:$0xff] (%p2032_p6) }
 0x2a8   : > { %1380 = vst.msk [vmem:[%s2570_s14 + $0x48] sm:$0xff] %vm639_vm0, %v1360_v52 }
 0x2a9   : > { %1465 = vst [vmem:[%s1407_s20 + $0x18] sm:$0xff] (%p2032_p6), %v1464_v12 }
 0x2aa   : > { %1467 = vst [vmem:[%s1407_s20 + $0x40] sm:$0xff] (%p2032_p6), %v1466_v15 }
 0x2ab   : > { %1475 = vst [vmem:[%s1407_s20 + $0x80] sm:$0xff] (%p2032_p6), %v1474_v3 }
 0x2ac   : > { %v1362_v34 = vpop.f32.mrf.mxu1 }
 0x2ad   : > { %v1363_v55 = vadd.f32 %v1362_v34, %v2316_v1  ;;  %v1462_v1 = vld [vmem:[%s2570_s14 + $0x10] sm:$0xff] (%p2032_p6) }
 0x2ae   : > { %1463 = vst [vmem:[%s1407_s20 + $0x10] sm:$0xff] (%p2032_p6), %v1462_v1  ;;  %v1468_v20 = vld [vmem:[%s2570_s14 + $0x28] sm:$0xff] (%p2032_p6) }
 0x2af   : > { %1381 = vst.msk [vmem:[%s2570_s14 + $0x50] sm:$0xff] %vm639_vm0, %v1363_v55  ;;  %v1476_v17 = vld [vmem:[%s2570_s14 + $0x48] sm:$0xff] (%p2032_p6) }
 0x2b0   : > { %1469 = vst [vmem:[%s1407_s20 + $0x48] sm:$0xff] (%p2032_p6), %v1468_v20 }
 0x2b1   : > { %1477 = vst [vmem:[%s1407_s20 + $0x88] sm:$0xff] (%p2032_p6), %v1476_v17 }
 0x2b3   : > { %1402 = sbr.rel (!%p2032_p6) target bundleno = 704 (0x2c0), region = 118 }
 0x2b4   : > { %v1364_v45 = vpop.f32.mrf.mxu1 }
 0x2b5   : > { %v1365_v49 = vadd.f32 %v1364_v45, %v2313_v23  ;;  %v1460_v23 = vld [vmem:[%s2570_s14 + $0x8] sm:$0xff] (%p2032_p6) }
 0x2b6   : > { %1461 = vst [vmem:[%s1407_s20 + $0x8] sm:$0xff] (%p2032_p6), %v1460_v23  ;;  %v1478_v41 = vld [vmem:[%s2570_s14 + $0x50] sm:$0xff] (%p2032_p6) }
 0x2b7   : > { %1382 = vst.msk [vmem:[%s2570_s14 + $0x58] sm:$0xff] %vm639_vm0, %v1365_v49 }
 0x2b8   : > { %1479 = vst [vmem:[%s1407_s20 + $0x90] sm:$0xff] %v1478_v41 }
 0x2be   : > { %v1480_v8 = vld [vmem:[%s2570_s14 + $0x58] sm:$0xff] }
 0x2bf   : > { %1481 = vst [vmem:[%s1407_s20 + $0x98] sm:$0xff] %v1480_v8 }
 0x2c0 PF: > { %s25_s19 = sadd.s32 1, %s1906_s19   ;;  %s2715_s10 = sld [smem:[#allocation4_spill]] }
 0x2c1   : > { %p22_p0 = scmp.ge.s32.totalorder %s25_s19, 6   ;;  %s2716_s22 = sld [smem:[#allocation5_spill]] }
 0x2c2   : > { %s2717_s29 = smov %s1886_s30  ;;  %s2718_s30 = smov %s2040_s28 }
 0x2c3   : > { %s2719_s15 = smov %s1898_s17  ;;  %s2720_s16 = smov %s1902_s18 }
 0x2c4   :  { %24 = sbr.rel (!%p22_p0) target bundleno = 9 (0x9), region = 198 }
 0x2c6   : > { %s2721_s17 = smov %s2715_s10 }
 0x2c7   : > { %s2722_s18 = smov %s2716_s22 }

</bundles_post_ra>
